<compile_context>
chip_gen: v5e
topology: v5e:2x2
jax: 0.10.0
libtpu: 0.0.40
codegen_flags: <defaults>
</compile_context>

<pallas_src>
import numpy as np
import jax
import jax.numpy as jnp
from jax.experimental import pallas as pl
from jax.experimental.pallas import tpu as pltpu


# ---------------------------------------------------------------------------
# Fused kernel: one grid step = nb folded batch elements
# ---------------------------------------------------------------------------
def _unet_up_fused_kernel(x0_ref, skip_ref, a_ref, d_ref, s_ref,
                          b1_ref, b2_ref, bias_ref, o_ref):
    """Fused unetUp_origin forward.

    x0_ref  : (1, R0, W*C0)      bf16   coarse input rows (R0 = nb*H)
    skip_ref: (1, R1, Wo*Cs)     bf16   skip rows         (R1 = nb*2H)
    a_ref   : (4, R1, R0)        bf16   deconv row-selectors (interleave + shift)
    d_ref   : (4, W*C0, Wo*Cy)   bf16   banded deconv matrices, one per kernel row
    s_ref   : (2, R1, R1)        bf16   conv row-shift selectors (kh=0 / kh=2)
    b1_ref  : (3, Wo*(Cy+Cs), Wo*Co) bf16  merged conv1 banded matrices
    b2_ref  : (3, Wo*Co, Wo*Co)  bf16   conv2 banded matrices
    bias_ref: (3, Wo*Co)         f32    [up, conv1, conv2] biases tiled along W
    o_ref   : (1, R1, Wo*Co)     f32    lane-dense output
    """
    f32 = jnp.float32
    bf16 = jnp.bfloat16

    x0 = x0_ref[0]                       # (R0, W*C0) bf16
    skip = skip_ref[0]                   # (R1, Wo*Cs) bf16
    bias = bias_ref[...]                 # (3, Wo*Co) f32

    # ---- up = ConvTranspose2d(k=4, s=2, p=1), polyphase form ----------------
    # y[oh] = sum_kh x[row(oh, kh)] @ D_kh; the row mapping (phase interleave +
    # +-1 shift + zero boundary, block-diagonal over batch) is the 0/1 matrix
    # A_kh, applied on the MXU before the weight matmul (exact in bf16).
    y = jnp.zeros((skip.shape[0], d_ref.shape[2]), f32)
    for kh in range(4):                  # static unroll
        xr = jnp.dot(a_ref[kh], x0, preferred_element_type=f32).astype(bf16)
        y = y + jnp.dot(xr, d_ref[kh], preferred_element_type=f32)
    y = y + bias[0]

    def conv3x3(act, w_ref):
        # out[r] = x[r-1] @ W0 + x[r] @ W1 + x[r+1] @ W2  (pad=1 via zero rows
        # in the shift selectors, block-diagonal over the folded batch).
        acc = jnp.dot(act, w_ref[1], preferred_element_type=f32)
        dn = jnp.dot(s_ref[0], act, preferred_element_type=f32).astype(bf16)
        acc = acc + jnp.dot(dn, w_ref[0], preferred_element_type=f32)
        up = jnp.dot(s_ref[1], act, preferred_element_type=f32).astype(bf16)
        acc = acc + jnp.dot(up, w_ref[2], preferred_element_type=f32)
        return acc

    # ---- conv1 = Conv3x3(pad=1) over concat([y, skip]) + ReLU ---------------
    cat = jnp.concatenate([y.astype(bf16), skip], axis=-1)   # (R1, Wo*(Cy+Cs))
    h1 = jnp.maximum(conv3x3(cat, b1_ref) + bias[1], 0.0).astype(bf16)

    # ---- conv2 = Conv3x3(pad=1) + ReLU --------------------------------------
    out = jnp.maximum(conv3x3(h1, b2_ref) + bias[2], 0.0)
    o_ref[0] = out.astype(o_ref.dtype)


# ---------------------------------------------------------------------------
# Host-side (numpy) weight / selector preprocessing — runs once per param set
# ---------------------------------------------------------------------------
def _deconv_banded_mats(w_up, width):
    """ConvTranspose2d(4,2,1) weight (Cin, Cout, 4, 4) -> (4, W*Cin, 2W*Cout)."""
    w_up = np.asarray(w_up, np.float32)
    cin, cout = w_up.shape[0], w_up.shape[1]
    wt = np.transpose(w_up, (2, 3, 0, 1))                   # (kh, kw, cin, cout)
    kw_idx = np.array([[3, 1], [2, 0]])                     # [rw, dw] -> kw
    wr = wt[:, kw_idx]                                      # (kh, rw, dw, cin, cout)
    dw = np.arange(2)[:, None, None, None]
    rw = np.arange(2)[None, :, None, None]
    iw = np.arange(width)[None, None, :, None]
    b = np.arange(width)[None, None, None, :]
    ind = (iw == b - 1 + rw + dw).astype(np.float32)        # (dw, rw, iw, b)
    d6 = np.einsum("drib,krdxy->kixbry", ind, wr)           # (4, iw, cin, b, rw, cout)
    return d6.reshape(4, width * cin, 2 * width * cout)


def _conv3x3_banded_mats(w_conv, width):
    """Conv2d(ks=3, s=1, p=1) weight (Cout, Cin, 3, 3) -> (3, W*Cin, W*Cout)."""
    w_conv = np.asarray(w_conv, np.float32)
    wt = np.transpose(w_conv, (2, 3, 1, 0))                 # (kh, kw, cin, cout)
    kw = np.arange(3)[:, None, None]
    wi = np.arange(width)[None, :, None]
    wo = np.arange(width)[None, None, :]
    ind = (wi == wo + kw - 1).astype(np.float32)            # (kw, wi, wo), pad=1
    b5 = np.einsum("kab,hkio->haibo", ind, wt)              # (kh, wi, cin, wo, cout)
    cin, cout = w_conv.shape[1], w_conv.shape[0]
    return b5.reshape(3, width * cin, width * cout)


def _deconv_row_selectors(nb, h):
    """0/1 matrices A_kh (4, nb*2H, nb*H): output row 2r <- x[r]@D1 + x[r-1]@D3,
    output row 2r+1 <- x[r]@D2 + x[r+1]@D0 (block-diagonal per batch element)."""
    ho = 2 * h
    a = np.zeros((4, nb * ho, nb * h), np.float32)
    for b in range(nb):
        for r in range(h):
            a[1, b * ho + 2 * r, b * h + r] = 1.0
            a[2, b * ho + 2 * r + 1, b * h + r] = 1.0
            if r >= 1:
                a[3, b * ho + 2 * r, b * h + r - 1] = 1.0
            if r + 1 < h:
                a[0, b * ho + 2 * r + 1, b * h + r + 1] = 1.0
    return a


def _conv_row_selectors(nb, rows):
    """0/1 shift matrices (2, nb*rows, nb*rows): S0[r,r-1]=1 (kh=0), S1[r,r+1]=1
    (kh=2); zero rows at block boundaries implement the H-direction padding."""
    s = np.zeros((2, nb * rows, nb * rows), np.float32)
    for b in range(nb):
        for r in range(rows):
            if r >= 1:
                s[0, b * rows + r, b * rows + r - 1] = 1.0
            if r + 1 < rows:
                s[1, b * rows + r, b * rows + r + 1] = 1.0
    return s


# ---------------------------------------------------------------------------
# Builder: preprocess once, return a jitted forward (PyTorch NCHW in/out)
# ---------------------------------------------------------------------------
def build_unet_up(params, inputs0_shape, skip_shapes, *, num_core_splits=2):
    """unetUp_origin.forward with is_deconv=True, unetConv2(is_batchnorm=False)."""
    n, c0, h, w = inputs0_shape
    cs = sum(s[1] for s in skip_shapes)
    ho, wo = 2 * h, 2 * w
    for s in skip_shapes:
        assert s[0] == n and (s[2], s[3]) == (ho, wo)
    cy = params["up_w"].shape[1]                            # up out channels
    cout = params["conv1_w"].shape[0]
    assert params["up_w"].shape[0] == c0
    assert params["conv1_w"].shape[1] == cy + cs
    assert params["conv2_w"].shape[0] == cout and cy == cout  # module invariant

    # Grid split: keep 2 "parallel" steps for v7x's two TCs when the batch allows,
    # otherwise fold everything into one step (strictly better on v5e/v6e).
    g = num_core_splits if (n >= num_core_splits and n % num_core_splits == 0) else 1
    nb = n // g
    r0, r1 = nb * h, nb * ho

    bf16 = jnp.bfloat16
    d_mats = jnp.asarray(_deconv_banded_mats(params["up_w"], w), bf16)
    b1y = _conv3x3_banded_mats(params["conv1_w"][:, :cy], wo)
    b1s = _conv3x3_banded_mats(params["conv1_w"][:, cy:], wo)
    b1 = jnp.asarray(np.concatenate([b1y, b1s], axis=1), bf16)   # merged K=Wo*(Cy+Cs)
    b2 = jnp.asarray(_conv3x3_banded_mats(params["conv2_w"], wo), bf16)
    a_sel = jnp.asarray(_deconv_row_selectors(nb, h), bf16)      # (4, r1, r0)
    s_sel = jnp.asarray(_conv_row_selectors(nb, ho), bf16)       # (2, r1, r1)
    biases = jnp.asarray(
        np.stack([np.tile(np.asarray(params["up_b"], np.float32), wo),
                  np.tile(np.asarray(params["conv1_b"], np.float32), wo),
                  np.tile(np.asarray(params["conv2_b"], np.float32), wo)], axis=0),
        jnp.float32)                                             # (3, wo*cout)

    k1 = wo * (cy + cs)
    flops_step = (4 * 2 * r1 * r0 * (w * c0)          # deconv row selectors
                  + 4 * 2 * r1 * (w * c0) * (wo * cy) # deconv banded matmuls
                  + 2 * 2 * r1 * r1 * k1              # conv1 row shifts
                  + 3 * 2 * r1 * k1 * (wo * cout)     # conv1 banded matmuls
                  + 2 * 2 * r1 * r1 * (wo * cout)     # conv2 row shifts
                  + 3 * 2 * r1 * (wo * cout) * (wo * cout))  # conv2 banded matmuls
    bytes_accessed = int(
        2 * (g * r0 * w * c0 + g * r1 * wo * cs)
        + 2 * (a_sel.size + d_mats.size + s_sel.size + b1.size + b2.size)
        + 4 * biases.size + 4 * g * r1 * wo * cout)

    fused = pl.pallas_call(
        _unet_up_fused_kernel,
        out_shape=jax.ShapeDtypeStruct((g, r1, wo * cout), jnp.float32),
        grid_spec=pltpu.PrefetchScalarGridSpec(
            num_scalar_prefetch=0,
            grid=(g,),
            in_specs=[
                pl.BlockSpec((1, r0, w * c0), lambda i: (i, 0, 0)),
                pl.BlockSpec((1, r1, wo * cs), lambda i: (i, 0, 0)),
                pl.BlockSpec((4, r1, r0), lambda i: (0, 0, 0)),
                pl.BlockSpec((4, w * c0, wo * cy), lambda i: (0, 0, 0)),
                pl.BlockSpec((2, r1, r1), lambda i: (0, 0, 0)),
                pl.BlockSpec((3, k1, wo * cout), lambda i: (0, 0, 0)),
                pl.BlockSpec((3, wo * cout, wo * cout), lambda i: (0, 0, 0)),
                pl.BlockSpec((3, wo * cout), lambda i: (0, 0)),
            ],
            out_specs=pl.BlockSpec((1, r1, wo * cout), lambda i: (i, 0, 0)),
        ),
        compiler_params=pltpu.CompilerParams(
            dimension_semantics=("parallel",)),
        cost_estimate=pl.CostEstimate(flops=g * flops_step, transcendentals=0,
                                      bytes_accessed=bytes_accessed),
    )

    def forward(inputs0_nchw, *skips_nchw):
        x0 = jnp.transpose(inputs0_nchw, (0, 2, 3, 1))           # NCHW -> NHWC
        skips = [jnp.transpose(s, (0, 2, 3, 1)) for s in skips_nchw]
        skip = skips[0] if len(skips) == 1 else jnp.concatenate(skips, axis=-1)
        # lane-dense (rows, W*C) layout with the batch folded into rows
        x0f = x0.reshape(g, r0, w * c0).astype(bf16)
        skipf = skip.reshape(g, r1, wo * cs).astype(bf16)
        out = fused(x0f, skipf, a_sel, d_mats, s_sel, b1, b2, biases)
        out = out.reshape(n, ho, wo, cout)
        return jnp.transpose(out, (0, 3, 1, 2))                  # NHWC -> NCHW

    return jax.jit(forward)


# ---------------------------------------------------------------------------
# Pure-XLA reference (PyTorch semantics) for the runtime self-check
# ---------------------------------------------------------------------------
def _reference_forward(params, inputs0, *skips):
    hp = jax.lax.Precision.HIGHEST
    w_up = params["up_w"][:, :, ::-1, ::-1]   # transposed conv == corr w/ flipped kernel
    y = jax.lax.conv_general_dilated(
        inputs0, w_up, window_strides=(1, 1), padding=((2, 2), (2, 2)),
        lhs_dilation=(2, 2), dimension_numbers=("NCHW", "IOHW", "NCHW"),
        precision=hp) + params["up_b"][None, :, None, None]
    x = jnp.concatenate([y, *skips], axis=1)
    x = jax.lax.conv_general_dilated(
        x, params["conv1_w"], (1, 1), ((1, 1), (1, 1)),
        dimension_numbers=("NCHW", "OIHW", "NCHW"),
        precision=hp) + params["conv1_b"][None, :, None, None]
    x = jnp.maximum(x, 0.0)
    x = jax.lax.conv_general_dilated(
        x, params["conv2_w"], (1, 1), ((1, 1), (1, 1)),
        dimension_numbers=("NCHW", "OIHW", "NCHW"),
        precision=hp) + params["conv2_b"][None, :, None, None]
    return jnp.maximum(x, 0.0)


if __name__ == "__main__":
    # Module config: unetUp_origin(in_size=16, out_size=8, is_deconv=True)
    in_size, out_size = 16, 8
    n, h, w = 4, 8, 8            # inputs0 is the coarse feature map (upsampled 2x)

    key = jax.random.PRNGKey(0)
    ks = jax.random.split(key, 8)
    params = {
        # ConvTranspose2d(out_size, out_size, 4, 2, 1): weight (Cin, Cout, 4, 4)
        "up_w":    0.1 * jax.random.normal(ks[0], (out_size, out_size, 4, 4), jnp.float32),
        "up_b":    0.1 * jax.random.normal(ks[1], (out_size,), jnp.float32),
        # Conv2d(in_size, out_size, 3, 1, 1): weight (Cout, Cin, 3, 3)
        "conv1_w": 0.1 * jax.random.normal(ks[2], (out_size, in_size, 3, 3), jnp.float32),
        "conv1_b": 0.1 * jax.random.normal(ks[3], (out_size,), jnp.float32),
        # Conv2d(out_size, out_size, 3, 1, 1)
        "conv2_w": 0.1 * jax.random.normal(ks[4], (out_size, out_size, 3, 3), jnp.float32),
        "conv2_b": 0.1 * jax.random.normal(ks[5], (out_size,), jnp.float32),
    }

    inputs0 = jax.random.normal(ks[6], (n, out_size, h, w), jnp.float32)                 # NCHW
    skip = jax.random.normal(ks[7], (n, in_size - out_size, 2 * h, 2 * w), jnp.float32)  # NCHW

    fwd = build_unet_up(params, inputs0.shape, [skip.shape])   # preprocess once
    out = jax.block_until_ready(fwd(inputs0, skip))
    assert out.shape == (n, out_size, 2 * h, 2 * w), out.shape
    assert out.dtype == jnp.float32

    ref = jax.block_until_ready(_reference_forward(params, inputs0, skip))
    err = float(jnp.max(jnp.abs(out - ref)))
    assert err < 5e-2, f"max abs error vs reference: {err}"
    print("KERNEL_OK")
</pallas_src>

<mosaic_0001>
module attributes {stable_mosaic.version = 11 : i64} {
  func.func @_unet_up_fused_kernel(%arg0: i32, %arg1: memref<1x16x64xbf16, #tpu.memory_space<vmem>>, %arg2: memref<1x32x128xbf16, #tpu.memory_space<vmem>>, %arg3: memref<4x32x16xbf16, #tpu.memory_space<vmem>>, %arg4: memref<4x64x128xbf16, #tpu.memory_space<vmem>>, %arg5: memref<2x32x32xbf16, #tpu.memory_space<vmem>>, %arg6: memref<3x256x128xbf16, #tpu.memory_space<vmem>>, %arg7: memref<3x128x128xbf16, #tpu.memory_space<vmem>>, %arg8: memref<3x128xf32, #tpu.memory_space<vmem>>, %arg9: memref<1x32x128xf32, #tpu.memory_space<vmem>>) attributes {dimension_semantics = [#tpu.dimension_semantics<parallel>], iteration_bounds = array<i64: 2>, scalar_prefetch = 0 : i64, scratch_operands = 0 : i64, tpu.core_type = #tpu.core_type<tc>, window_params = [{transform_indices = @transform_0, window_bounds = array<i64: 1, 16, 64>}, {transform_indices = @transform_1, window_bounds = array<i64: 1, 32, 128>}, {pipeline_mode = #tpu.pipeline_mode<synchronous>, transform_indices = @transform_2, window_bounds = array<i64: 4, 32, 16>}, {pipeline_mode = #tpu.pipeline_mode<synchronous>, transform_indices = @transform_3, window_bounds = array<i64: 4, 64, 128>}, {pipeline_mode = #tpu.pipeline_mode<synchronous>, transform_indices = @transform_4, window_bounds = array<i64: 2, 32, 32>}, {pipeline_mode = #tpu.pipeline_mode<synchronous>, transform_indices = @transform_5, window_bounds = array<i64: 3, 256, 128>}, {pipeline_mode = #tpu.pipeline_mode<synchronous>, transform_indices = @transform_6, window_bounds = array<i64: 3, 128, 128>}, {pipeline_mode = #tpu.pipeline_mode<synchronous>, transform_indices = @transform_7, window_bounds = array<i64: 3, 128>}, {transform_indices = @transform_8, window_bounds = array<i64: 1, 32, 128>}]} {
    %c0 = arith.constant 0 : index
    %c0_0 = arith.constant 0 : index
    %c0_1 = arith.constant 0 : index
    %0 = vector.load %arg1[%c0, %c0_0, %c0_1] : memref<1x16x64xbf16, #tpu.memory_space<vmem>>, vector<1x16x64xbf16>
    %1 = vector.shape_cast %0 : vector<1x16x64xbf16> to vector<16x64xbf16>
    %c0_2 = arith.constant 0 : index
    %c0_3 = arith.constant 0 : index
    %c0_4 = arith.constant 0 : index
    %2 = vector.load %arg2[%c0_2, %c0_3, %c0_4] : memref<1x32x128xbf16, #tpu.memory_space<vmem>>, vector<1x32x128xbf16>
    %3 = vector.shape_cast %2 : vector<1x32x128xbf16> to vector<32x128xbf16>
    %c0_5 = arith.constant 0 : index
    %c0_6 = arith.constant 0 : index
    %4 = vector.load %arg8[%c0_5, %c0_6] : memref<3x128xf32, #tpu.memory_space<vmem>>, vector<3x128xf32>
    %cst = arith.constant 0.000000e+00 : f32
    %5 = vector.broadcast %cst : f32 to vector<32x128xf32>
    %c0_7 = arith.constant 0 : index
    %c0_8 = arith.constant 0 : index
    %c0_9 = arith.constant 0 : index
    %6 = vector.load %arg3[%c0_7, %c0_8, %c0_9] : memref<4x32x16xbf16, #tpu.memory_space<vmem>>, vector<1x32x16xbf16>
    %7 = vector.shape_cast %6 : vector<1x32x16xbf16> to vector<32x16xbf16>
    %cst_10 = arith.constant dense<0.000000e+00> : vector<32x64xf32>
    %8 = tpu.matmul %7, %1, %cst_10 {dimension_numbers = #tpu.dot_dimension_numbers<[1], [0], [0], [1], [0, 0, 1, 1], [], []>} : vector<32x16xbf16>, vector<16x64xbf16>, vector<32x64xf32> -> vector<32x64xf32>
    %9 = arith.truncf %8 : vector<32x64xf32> to vector<32x64xbf16>
    %c0_11 = arith.constant 0 : index
    %c0_12 = arith.constant 0 : index
    %c0_13 = arith.constant 0 : index
    %10 = vector.load %arg4[%c0_11, %c0_12, %c0_13] : memref<4x64x128xbf16, #tpu.memory_space<vmem>>, vector<1x64x128xbf16>
    %11 = vector.shape_cast %10 : vector<1x64x128xbf16> to vector<64x128xbf16>
    %cst_14 = arith.constant dense<0.000000e+00> : vector<32x128xf32>
    %12 = tpu.matmul %9, %11, %cst_14 {dimension_numbers = #tpu.dot_dimension_numbers<[1], [0], [0], [1], [0, 0, 1, 1], [], []>} : vector<32x64xbf16>, vector<64x128xbf16>, vector<32x128xf32> -> vector<32x128xf32>
    %13 = arith.addf %5, %12 : vector<32x128xf32>
    %c1 = arith.constant 1 : index
    %c0_15 = arith.constant 0 : index
    %c0_16 = arith.constant 0 : index
    %14 = vector.load %arg3[%c1, %c0_15, %c0_16] : memref<4x32x16xbf16, #tpu.memory_space<vmem>>, vector<1x32x16xbf16>
    %15 = vector.shape_cast %14 : vector<1x32x16xbf16> to vector<32x16xbf16>
    %cst_17 = arith.constant dense<0.000000e+00> : vector<32x64xf32>
    %16 = tpu.matmul %15, %1, %cst_17 {dimension_numbers = #tpu.dot_dimension_numbers<[1], [0], [0], [1], [0, 0, 1, 1], [], []>} : vector<32x16xbf16>, vector<16x64xbf16>, vector<32x64xf32> -> vector<32x64xf32>
    %17 = arith.truncf %16 : vector<32x64xf32> to vector<32x64xbf16>
    %c1_18 = arith.constant 1 : index
    %c0_19 = arith.constant 0 : index
    %c0_20 = arith.constant 0 : index
    %18 = vector.load %arg4[%c1_18, %c0_19, %c0_20] : memref<4x64x128xbf16, #tpu.memory_space<vmem>>, vector<1x64x128xbf16>
    %19 = vector.shape_cast %18 : vector<1x64x128xbf16> to vector<64x128xbf16>
    %cst_21 = arith.constant dense<0.000000e+00> : vector<32x128xf32>
    %20 = tpu.matmul %17, %19, %cst_21 {dimension_numbers = #tpu.dot_dimension_numbers<[1], [0], [0], [1], [0, 0, 1, 1], [], []>} : vector<32x64xbf16>, vector<64x128xbf16>, vector<32x128xf32> -> vector<32x128xf32>
    %21 = arith.addf %13, %20 : vector<32x128xf32>
    %c2 = arith.constant 2 : index
    %c0_22 = arith.constant 0 : index
    %c0_23 = arith.constant 0 : index
    %22 = vector.load %arg3[%c2, %c0_22, %c0_23] : memref<4x32x16xbf16, #tpu.memory_space<vmem>>, vector<1x32x16xbf16>
    %23 = vector.shape_cast %22 : vector<1x32x16xbf16> to vector<32x16xbf16>
    %cst_24 = arith.constant dense<0.000000e+00> : vector<32x64xf32>
    %24 = tpu.matmul %23, %1, %cst_24 {dimension_numbers = #tpu.dot_dimension_numbers<[1], [0], [0], [1], [0, 0, 1, 1], [], []>} : vector<32x16xbf16>, vector<16x64xbf16>, vector<32x64xf32> -> vector<32x64xf32>
    %25 = arith.truncf %24 : vector<32x64xf32> to vector<32x64xbf16>
    %c2_25 = arith.constant 2 : index
    %c0_26 = arith.constant 0 : index
    %c0_27 = arith.constant 0 : index
    %26 = vector.load %arg4[%c2_25, %c0_26, %c0_27] : memref<4x64x128xbf16, #tpu.memory_space<vmem>>, vector<1x64x128xbf16>
    %27 = vector.shape_cast %26 : vector<1x64x128xbf16> to vector<64x128xbf16>
    %cst_28 = arith.constant dense<0.000000e+00> : vector<32x128xf32>
    %28 = tpu.matmul %25, %27, %cst_28 {dimension_numbers = #tpu.dot_dimension_numbers<[1], [0], [0], [1], [0, 0, 1, 1], [], []>} : vector<32x64xbf16>, vector<64x128xbf16>, vector<32x128xf32> -> vector<32x128xf32>
    %29 = arith.addf %21, %28 : vector<32x128xf32>
    %c3 = arith.constant 3 : index
    %c0_29 = arith.constant 0 : index
    %c0_30 = arith.constant 0 : index
    %30 = vector.load %arg3[%c3, %c0_29, %c0_30] : memref<4x32x16xbf16, #tpu.memory_space<vmem>>, vector<1x32x16xbf16>
    %31 = vector.shape_cast %30 : vector<1x32x16xbf16> to vector<32x16xbf16>
    %cst_31 = arith.constant dense<0.000000e+00> : vector<32x64xf32>
    %32 = tpu.matmul %31, %1, %cst_31 {dimension_numbers = #tpu.dot_dimension_numbers<[1], [0], [0], [1], [0, 0, 1, 1], [], []>} : vector<32x16xbf16>, vector<16x64xbf16>, vector<32x64xf32> -> vector<32x64xf32>
    %33 = arith.truncf %32 : vector<32x64xf32> to vector<32x64xbf16>
    %c3_32 = arith.constant 3 : index
    %c0_33 = arith.constant 0 : index
    %c0_34 = arith.constant 0 : index
    %34 = vector.load %arg4[%c3_32, %c0_33, %c0_34] : memref<4x64x128xbf16, #tpu.memory_space<vmem>>, vector<1x64x128xbf16>
    %35 = vector.shape_cast %34 : vector<1x64x128xbf16> to vector<64x128xbf16>
    %cst_35 = arith.constant dense<0.000000e+00> : vector<32x128xf32>
    %36 = tpu.matmul %33, %35, %cst_35 {dimension_numbers = #tpu.dot_dimension_numbers<[1], [0], [0], [1], [0, 0, 1, 1], [], []>} : vector<32x64xbf16>, vector<64x128xbf16>, vector<32x128xf32> -> vector<32x128xf32>
    %37 = arith.addf %29, %36 : vector<32x128xf32>
    %38 = vector.extract_strided_slice %4 {offsets = [0, 0], sizes = [1, 128], strides = [1, 1]} : vector<3x128xf32> to vector<1x128xf32>
    %39 = vector.shape_cast %38 : vector<1x128xf32> to vector<128xf32>
    %40 = vector.shape_cast %39 : vector<128xf32> to vector<1x128xf32>
    %41 = vector.broadcast %40 : vector<1x128xf32> to vector<32x128xf32>
    %42 = arith.addf %37, %41 : vector<32x128xf32>
    %43 = arith.truncf %42 : vector<32x128xf32> to vector<32x128xbf16>
    %44 = tpu.concatenate %43, %3 in 1 : vector<32x128xbf16>, vector<32x128xbf16> -> vector<32x256xbf16>
    %c1_36 = arith.constant 1 : index
    %c0_37 = arith.constant 0 : index
    %c0_38 = arith.constant 0 : index
    %45 = vector.load %arg6[%c1_36, %c0_37, %c0_38] : memref<3x256x128xbf16, #tpu.memory_space<vmem>>, vector<1x256x128xbf16>
    %46 = vector.shape_cast %45 : vector<1x256x128xbf16> to vector<256x128xbf16>
    %cst_39 = arith.constant dense<0.000000e+00> : vector<32x128xf32>
    %47 = tpu.matmul %44, %46, %cst_39 {dimension_numbers = #tpu.dot_dimension_numbers<[1], [0], [0], [1], [0, 0, 1, 1], [], []>} : vector<32x256xbf16>, vector<256x128xbf16>, vector<32x128xf32> -> vector<32x128xf32>
    %c0_40 = arith.constant 0 : index
    %c0_41 = arith.constant 0 : index
    %c0_42 = arith.constant 0 : index
    %48 = vector.load %arg5[%c0_40, %c0_41, %c0_42] : memref<2x32x32xbf16, #tpu.memory_space<vmem>>, vector<1x32x32xbf16>
    %49 = vector.shape_cast %48 : vector<1x32x32xbf16> to vector<32x32xbf16>
    %cst_43 = arith.constant dense<0.000000e+00> : vector<32x256xf32>
    %50 = tpu.matmul %49, %44, %cst_43 {dimension_numbers = #tpu.dot_dimension_numbers<[1], [0], [0], [1], [0, 0, 1, 1], [], []>} : vector<32x32xbf16>, vector<32x256xbf16>, vector<32x256xf32> -> vector<32x256xf32>
    %51 = arith.truncf %50 : vector<32x256xf32> to vector<32x256xbf16>
    %c0_44 = arith.constant 0 : index
    %c0_45 = arith.constant 0 : index
    %c0_46 = arith.constant 0 : index
    %52 = vector.load %arg6[%c0_44, %c0_45, %c0_46] : memref<3x256x128xbf16, #tpu.memory_space<vmem>>, vector<1x256x128xbf16>
    %53 = vector.shape_cast %52 : vector<1x256x128xbf16> to vector<256x128xbf16>
    %cst_47 = arith.constant dense<0.000000e+00> : vector<32x128xf32>
    %54 = tpu.matmul %51, %53, %cst_47 {dimension_numbers = #tpu.dot_dimension_numbers<[1], [0], [0], [1], [0, 0, 1, 1], [], []>} : vector<32x256xbf16>, vector<256x128xbf16>, vector<32x128xf32> -> vector<32x128xf32>
    %55 = arith.addf %47, %54 : vector<32x128xf32>
    %c1_48 = arith.constant 1 : index
    %c0_49 = arith.constant 0 : index
    %c0_50 = arith.constant 0 : index
    %56 = vector.load %arg5[%c1_48, %c0_49, %c0_50] : memref<2x32x32xbf16, #tpu.memory_space<vmem>>, vector<1x32x32xbf16>
    %57 = vector.shape_cast %56 : vector<1x32x32xbf16> to vector<32x32xbf16>
    %cst_51 = arith.constant dense<0.000000e+00> : vector<32x256xf32>
    %58 = tpu.matmul %57, %44, %cst_51 {dimension_numbers = #tpu.dot_dimension_numbers<[1], [0], [0], [1], [0, 0, 1, 1], [], []>} : vector<32x32xbf16>, vector<32x256xbf16>, vector<32x256xf32> -> vector<32x256xf32>
    %59 = arith.truncf %58 : vector<32x256xf32> to vector<32x256xbf16>
    %c2_52 = arith.constant 2 : index
    %c0_53 = arith.constant 0 : index
    %c0_54 = arith.constant 0 : index
    %60 = vector.load %arg6[%c2_52, %c0_53, %c0_54] : memref<3x256x128xbf16, #tpu.memory_space<vmem>>, vector<1x256x128xbf16>
    %61 = vector.shape_cast %60 : vector<1x256x128xbf16> to vector<256x128xbf16>
    %cst_55 = arith.constant dense<0.000000e+00> : vector<32x128xf32>
    %62 = tpu.matmul %59, %61, %cst_55 {dimension_numbers = #tpu.dot_dimension_numbers<[1], [0], [0], [1], [0, 0, 1, 1], [], []>} : vector<32x256xbf16>, vector<256x128xbf16>, vector<32x128xf32> -> vector<32x128xf32>
    %63 = arith.addf %55, %62 : vector<32x128xf32>
    %64 = vector.extract_strided_slice %4 {offsets = [1, 0], sizes = [1, 128], strides = [1, 1]} : vector<3x128xf32> to vector<1x128xf32>
    %65 = vector.shape_cast %64 : vector<1x128xf32> to vector<128xf32>
    %66 = vector.shape_cast %65 : vector<128xf32> to vector<1x128xf32>
    %67 = vector.broadcast %66 : vector<1x128xf32> to vector<32x128xf32>
    %68 = arith.addf %63, %67 : vector<32x128xf32>
    %cst_56 = arith.constant 0.000000e+00 : f32
    %69 = vector.broadcast %cst_56 : f32 to vector<32x128xf32>
    %70 = arith.maximumf %68, %69 : vector<32x128xf32>
    %71 = arith.truncf %70 : vector<32x128xf32> to vector<32x128xbf16>
    %c1_57 = arith.constant 1 : index
    %c0_58 = arith.constant 0 : index
    %c0_59 = arith.constant 0 : index
    %72 = vector.load %arg7[%c1_57, %c0_58, %c0_59] : memref<3x128x128xbf16, #tpu.memory_space<vmem>>, vector<1x128x128xbf16>
    %73 = vector.shape_cast %72 : vector<1x128x128xbf16> to vector<128x128xbf16>
    %cst_60 = arith.constant dense<0.000000e+00> : vector<32x128xf32>
    %74 = tpu.matmul %71, %73, %cst_60 {dimension_numbers = #tpu.dot_dimension_numbers<[1], [0], [0], [1], [0, 0, 1, 1], [], []>} : vector<32x128xbf16>, vector<128x128xbf16>, vector<32x128xf32> -> vector<32x128xf32>
    %c0_61 = arith.constant 0 : index
    %c0_62 = arith.constant 0 : index
    %c0_63 = arith.constant 0 : index
    %75 = vector.load %arg5[%c0_61, %c0_62, %c0_63] : memref<2x32x32xbf16, #tpu.memory_space<vmem>>, vector<1x32x32xbf16>
    %76 = vector.shape_cast %75 : vector<1x32x32xbf16> to vector<32x32xbf16>
    %cst_64 = arith.constant dense<0.000000e+00> : vector<32x128xf32>
    %77 = tpu.matmul %76, %71, %cst_64 {dimension_numbers = #tpu.dot_dimension_numbers<[1], [0], [0], [1], [0, 0, 1, 1], [], []>} : vector<32x32xbf16>, vector<32x128xbf16>, vector<32x128xf32> -> vector<32x128xf32>
    %78 = arith.truncf %77 : vector<32x128xf32> to vector<32x128xbf16>
    %c0_65 = arith.constant 0 : index
    %c0_66 = arith.constant 0 : index
    %c0_67 = arith.constant 0 : index
    %79 = vector.load %arg7[%c0_65, %c0_66, %c0_67] : memref<3x128x128xbf16, #tpu.memory_space<vmem>>, vector<1x128x128xbf16>
    %80 = vector.shape_cast %79 : vector<1x128x128xbf16> to vector<128x128xbf16>
    %cst_68 = arith.constant dense<0.000000e+00> : vector<32x128xf32>
    %81 = tpu.matmul %78, %80, %cst_68 {dimension_numbers = #tpu.dot_dimension_numbers<[1], [0], [0], [1], [0, 0, 1, 1], [], []>} : vector<32x128xbf16>, vector<128x128xbf16>, vector<32x128xf32> -> vector<32x128xf32>
    %82 = arith.addf %74, %81 : vector<32x128xf32>
    %c1_69 = arith.constant 1 : index
    %c0_70 = arith.constant 0 : index
    %c0_71 = arith.constant 0 : index
    %83 = vector.load %arg5[%c1_69, %c0_70, %c0_71] : memref<2x32x32xbf16, #tpu.memory_space<vmem>>, vector<1x32x32xbf16>
    %84 = vector.shape_cast %83 : vector<1x32x32xbf16> to vector<32x32xbf16>
    %cst_72 = arith.constant dense<0.000000e+00> : vector<32x128xf32>
    %85 = tpu.matmul %84, %71, %cst_72 {dimension_numbers = #tpu.dot_dimension_numbers<[1], [0], [0], [1], [0, 0, 1, 1], [], []>} : vector<32x32xbf16>, vector<32x128xbf16>, vector<32x128xf32> -> vector<32x128xf32>
    %86 = arith.truncf %85 : vector<32x128xf32> to vector<32x128xbf16>
    %c2_73 = arith.constant 2 : index
    %c0_74 = arith.constant 0 : index
    %c0_75 = arith.constant 0 : index
    %87 = vector.load %arg7[%c2_73, %c0_74, %c0_75] : memref<3x128x128xbf16, #tpu.memory_space<vmem>>, vector<1x128x128xbf16>
    %88 = vector.shape_cast %87 : vector<1x128x128xbf16> to vector<128x128xbf16>
    %cst_76 = arith.constant dense<0.000000e+00> : vector<32x128xf32>
    %89 = tpu.matmul %86, %88, %cst_76 {dimension_numbers = #tpu.dot_dimension_numbers<[1], [0], [0], [1], [0, 0, 1, 1], [], []>} : vector<32x128xbf16>, vector<128x128xbf16>, vector<32x128xf32> -> vector<32x128xf32>
    %90 = arith.addf %82, %89 : vector<32x128xf32>
    %91 = vector.extract_strided_slice %4 {offsets = [2, 0], sizes = [1, 128], strides = [1, 1]} : vector<3x128xf32> to vector<1x128xf32>
    %92 = vector.shape_cast %91 : vector<1x128xf32> to vector<128xf32>
    %93 = vector.shape_cast %92 : vector<128xf32> to vector<1x128xf32>
    %94 = vector.broadcast %93 : vector<1x128xf32> to vector<32x128xf32>
    %95 = arith.addf %90, %94 : vector<32x128xf32>
    %cst_77 = arith.constant 0.000000e+00 : f32
    %96 = vector.broadcast %cst_77 : f32 to vector<32x128xf32>
    %97 = arith.maximumf %95, %96 : vector<32x128xf32>
    %c0_78 = arith.constant 0 : index
    %c0_79 = arith.constant 0 : index
    %c0_80 = arith.constant 0 : index
    %98 = vector.load %arg9[%c0_78, %c0_79, %c0_80] : memref<1x32x128xf32, #tpu.memory_space<vmem>>, vector<1x32x128xf32>
    %99 = vector.shape_cast %98 : vector<1x32x128xf32> to vector<32x128xf32>
    %100 = vector.shape_cast %97 : vector<32x128xf32> to vector<1x32x128xf32>
    tpu.vector_store %arg9[%c0_78, %c0_79, %c0_80], %100 {strides = array<i32>} : memref<1x32x128xf32, #tpu.memory_space<vmem>>, vector<1x32x128xf32>,
    return
  }
  func.func @transform_0(%arg0: i32) -> (i32, i32, i32) {
    %c0_i32 = arith.constant 0 : i32
    %c0_i32_0 = arith.constant 0 : i32
    %c0_i32_1 = arith.constant 0 : i32
    return %arg0, %c0_i32, %c0_i32_0 : i32, i32, i32
  }
  func.func @transform_1(%arg0: i32) -> (i32, i32, i32) {
    %c0_i32 = arith.constant 0 : i32
    %c0_i32_0 = arith.constant 0 : i32
    %c0_i32_1 = arith.constant 0 : i32
    return %arg0, %c0_i32, %c0_i32_0 : i32, i32, i32
  }
  func.func @transform_2(%arg0: i32) -> (i32, i32, i32) {
    %c0_i32 = arith.constant 0 : i32
    %c0_i32_0 = arith.constant 0 : i32
    %c0_i32_1 = arith.constant 0 : i32
    %c0_i32_2 = arith.constant 0 : i32
    return %c0_i32, %c0_i32_0, %c0_i32_1 : i32, i32, i32
  }
  func.func @transform_3(%arg0: i32) -> (i32, i32, i32) {
    %c0_i32 = arith.constant 0 : i32
    %c0_i32_0 = arith.constant 0 : i32
    %c0_i32_1 = arith.constant 0 : i32
    %c0_i32_2 = arith.constant 0 : i32
    return %c0_i32, %c0_i32_0, %c0_i32_1 : i32, i32, i32
  }
  func.func @transform_4(%arg0: i32) -> (i32, i32, i32) {
    %c0_i32 = arith.constant 0 : i32
    %c0_i32_0 = arith.constant 0 : i32
    %c0_i32_1 = arith.constant 0 : i32
    %c0_i32_2 = arith.constant 0 : i32
    return %c0_i32, %c0_i32_0, %c0_i32_1 : i32, i32, i32
  }
  func.func @transform_5(%arg0: i32) -> (i32, i32, i32) {
    %c0_i32 = arith.constant 0 : i32
    %c0_i32_0 = arith.constant 0 : i32
    %c0_i32_1 = arith.constant 0 : i32
    %c0_i32_2 = arith.constant 0 : i32
    return %c0_i32, %c0_i32_0, %c0_i32_1 : i32, i32, i32
  }
  func.func @transform_6(%arg0: i32) -> (i32, i32, i32) {
    %c0_i32 = arith.constant 0 : i32
    %c0_i32_0 = arith.constant 0 : i32
    %c0_i32_1 = arith.constant 0 : i32
    %c0_i32_2 = arith.constant 0 : i32
    return %c0_i32, %c0_i32_0, %c0_i32_1 : i32, i32, i32
  }
  func.func @transform_7(%arg0: i32) -> (i32, i32) {
    %c0_i32 = arith.constant 0 : i32
    %c0_i32_0 = arith.constant 0 : i32
    %c0_i32_1 = arith.constant 0 : i32
    return %c0_i32, %c0_i32_0 : i32, i32
  }
  func.func @transform_8(%arg0: i32) -> (i32, i32, i32) {
    %c0_i32 = arith.constant 0 : i32
    %c0_i32_0 = arith.constant 0 : i32
    %c0_i32_1 = arith.constant 0 : i32
    return %arg0, %c0_i32, %c0_i32_0 : i32, i32, i32
  }
}

</mosaic_0001>

<bundles_post_ra>
// kernel: forward.1
= control target key start
LH: loop header
LB: loop body
LE: loop exit
PB: predicated region body
PF: predicated region fallthrough
CT: control target
= control target key end

     0   :  { %s2559_s27 = smov 0   ;;  %s2950_s0 = inlined_call_operand.vmem [shape: bf16[2,16,64], index: 0, kind: input, shape index: {}]   ;;  %s2951_s1 = inlined_call_operand.vmem [shape: bf16[2,32,128], index: 1, kind: input, shape index: {}]   ;;  %s2952_s2 = inlined_call_operand.vmem [shape: bf16[4,32,16], index: 2, kind: input, shape index: {}]   ;;  %s2953_s3 = inlined_call_operand.vmem [shape: bf16[4,64,128], index: 3, kind: input, shape index: {}]   ;;  %s2954_s4 = inlined_call_operand.vmem [shape: bf16[2,32,32], index: 4, kind: input, shape index: {}]   ;;  %s2955_s5 = inlined_call_operand.vmem [shape: bf16[3,256,128], index: 5, kind: input, shape index: {}]   ;;  %s2956_s6 = inlined_call_operand.vmem [shape: bf16[3,128,128], index: 6, kind: input, shape index: {}]   ;;  %s2957_s7 = inlined_call_operand.vmem [shape: f32[3,128], index: 7, kind: input, shape index: {}]   ;;  %s2958_s8 = inlined_call_operand.vmem [shape: f32[2,32,128], index: 8, kind: output, shape index: {}]  }
   0x1 LB: > { %s1799_s28 = sadd.s32 4294967295, %s2512_s27   ;;  %p1803_p0 = scmp.ge.s32.totalorder %s2512_s27, 1  ;;  %s2512_s27 = sphi %s2559_s27, %s18_s27  }
   0x2   : > { %p272_p1 = scmp.lt.s32.totalorder %s2512_s27, 3 }
   0x4   : > { %p273_p2 = pnand %p1803_p0, %p272_p1 }
   0x5   : > { %p311_p3 = scmp.lt.s32.totalorder (!%p273_p2), %s1799_s28, 1 }
   0x6   : > { %276 = sbr.rel (%p273_p2) target bundleno = 1269 (0x4f5), region = 52 }
   0xb   : > { %s2960_s28 = smov (!%p311_p3, %s1799_s28), 1  ;;  %v2400_v1 = vld [vmem:[%s2952_s2 + $0x10] sm:$0xff]  ;;  %v2394_v2 = vld [vmem:[%s2952_s2] sm:$0xff]  ;;  %vm354_vm0 = vcmask 130048   ;;  %v2401_v3 = vld [vmem:[%s2952_s2 + $0x18] sm:$0xff]  ;;  %vm465_vm1 = vcmask 523264  }
   0xc   : > { %s2388_s29 = sshll.u32 %s2960_s28, 3  ;;  %v2395_v4 = vld [vmem:[%s2952_s2 + $0x8] sm:$0xff]  ;;  %v2405_v5 = vld [vmem:[%s2953_s3 + $0x38] sm:$0xff]  ;;  %v2406_v6 = vld [vmem:[%s2952_s2 + $0x20] sm:$0xff]  ;;  %s2389_s23 = sshll.u32 %s2960_s28, 4  ;;  %vm828_vm2 = vcmask 261120  }
   0xd   : > { %s315_s10 = scalar_lea.vmem %s2950_s0, %s2388_s29  ;;  %476 = vmatpush.bf16.msra.mxu2 %v2405_v5  ;;  %2494 = vmatpush.bf16.msra.mxu3 %v2405_v5  ;;  %v2407_v7 = vld [vmem:[%s2952_s2 + $0x28] sm:$0xff]  ;;  %v2404_v8 = vld [vmem:[%s2953_s3 + $0x30] sm:$0xff]  ;;  %v2402_v10 = vld [vmem:[%s2953_s3 + $0x20] sm:$0xff]  ;;  %s320_s30 = scalar_lea.vmem %s2951_s1, %s2389_s23 }
   0xe   : > { %v2391_v0 = vld [vmem:[%s315_s10] sm:$0xff]  ;;  %v2403_v9 = vld [vmem:[%s2953_s3 + $0x28] sm:$0xff]  ;;  %v2399_v11 = vld [vmem:[%s2953_s3 + $0x18] sm:$0xff]  ;;  %s2390_s17 = sshll.u32 %s2960_s28, 5 }
   0xf   : > { %418 = vmatpush.bf16.msra.mxu1 %v2391_v0  ;;  %368 = vmatpush.bf16.msra.mxu0 %v2391_v0  ;;  %v2411_v12 = vld [vmem:[%s2953_s3 + $0x58] sm:$0xff]  ;;  %v2398_v13 = vld [vmem:[%s2953_s3 + $0x10] sm:$0xff]  ;;  %v2397_v16 = vld [vmem:[%s2953_s3 + $0x8] sm:$0xff]  ;;  %s325_s20 = scalar_lea.vmem %s2958_s8, %s2390_s17 }
  0x10   : > { %v2410_v17 = vld [vmem:[%s2953_s3 + $0x50] sm:$0xff]  ;;  %v2396_v18 = vld [vmem:[%s2953_s3] sm:$0xff]  ;;  %v2409_v22 = vld [vmem:[%s2953_s3 + $0x48] sm:$0xff] }
  0x11   : > { %477 = vmatpush.bf16.msra.mxu2 %v2404_v8  ;;  %2495 = vmatpush.bf16.msra.mxu3 %v2404_v8  ;;  %v2408_v23 = vld [vmem:[%s2953_s3 + $0x40] sm:$0xff]  ;;  %v2412_v26 = vld [vmem:[%s2952_s2 + $0x30] sm:$0xff]  ;;  %v2413_v32 = vld [vmem:[%s2952_s2 + $0x38] sm:$0xff] }
  0x12   : > { %1836 = vmatmul.msk.bf16.vlgmr.msra.gmra.mxu1 %vm354_vm0, %v2400_v1  ;;  %1822 = vmatmul.msk.bf16.vlgmr.msra.gmra.mxu0 %vm354_vm0, %v2394_v2  ;;  %v2417_v39 = vld [vmem:[%s2953_s3 + $0x78] sm:$0xff]  ;;  %v2416_v40 = vld [vmem:[%s2953_s3 + $0x70] sm:$0xff]  ;;  %v2415_v41 = vld [vmem:[%s2953_s3 + $0x68] sm:$0xff] }
  0x13   : > { %568 = vmatpush.bf16.msrb.mxu0 %v2391_v0  ;;  %625 = vmatpush.bf16.msrb.mxu1 %v2411_v12  ;;  %v2414_v42 = vld [vmem:[%s2953_s3 + $0x60] sm:$0xff]  ;;  %v2443_v54 = vld [vmem:[%s2955_s5 + $0x38] sm:$0xff]  ;;  %v2442_v56 = vld [vmem:[%s2955_s5 + $0x30] sm:$0xff] }
  0x14   : > { %v2441_v57 = vld [vmem:[%s2955_s5 + $0x28] sm:$0xff]  ;;  %v2440_v59 = vld [vmem:[%s2955_s5 + $0x20] sm:$0xff]  ;;  %v2439_v61 = vld [vmem:[%s2955_s5 + $0x18] sm:$0xff] }
  0x15   : > { %478 = vmatpush.bf16.msra.mxu2 %v2403_v9  ;;  %2496 = vmatpush.bf16.msra.mxu3 %v2403_v9  ;;  %v2677_v60 = vld [vmem:[%s320_s30 + $0x8] sm:$0xff]  ;;  %v2683_v62 = vld [vmem:[%s320_s30] sm:$0xff]  ;;  %v2438_v2 = vld [vmem:[%s2955_s5 + $0x10] sm:$0xff] }
  0x16   : > { %v2689_v1 = vld [vmem:[%s2954_s4] sm:$0xff] }
  0x17   : > { %626 = vmatpush.bf16.msrb.mxu1 %v2410_v17  ;;  %v2702_v5 = vld [vmem:[%s2957_s7] sm:$0x7] }
  0x18   : > { %v748_v12 = vperm.slane %v2702_v5, 0 }
  0x19   : > { %479 = vmatpush.bf16.msra.mxu2 %v2402_v10  ;;  %2497 = vmatpush.bf16.msra.mxu3 %v2402_v10 }
  0x1b   : > { %627 = vmatpush.bf16.msrb.mxu1 %v2409_v22 }
  0x1d   : > { %672 = vmatpush.bf16.msrb.mxu2 %v2391_v0  ;;  %525 = vmatpush.bf16.msrb.mxu3 %v2399_v11 }
  0x1f   : > { %628 = vmatpush.bf16.msrb.mxu1 %v2408_v23 }
  0x21   : > { %526 = vmatpush.bf16.msrb.mxu3 %v2398_v13 }
  0x22   : > { %1837 = vmatmul.msk.bf16.gmra.mxu1 %vm354_vm0, %v2401_v3  ;;  %1823 = vmatmul.msk.bf16.gmra.mxu0 %vm354_vm0, %v2395_v4  ;;  %v2437_v3 = vld [vmem:[%s2955_s5 + $0x8] sm:$0xff] }
  0x23   : > { %860 = vmatpush.bf16.msra.mxu1 %v2677_v60 }
  0x25   : > { %527 = vmatpush.bf16.msrb.mxu3 %v2397_v16  ;;  %v2711_v16 = vld [vmem:[%s2954_s4 + $0x8] sm:$0xff] }
  0x27   : > { %861 = vmatpush.bf16.msra.mxu1 %v2683_v62 }
  0x29   : > { %528 = vmatpush.bf16.msrb.mxu3 %v2396_v18 }
  0x32   : > { %1894 = vmatmul.msk.bf16.vlgmr.msrb.gmra.mxu0 %vm354_vm0, %v2406_v6 }
  0x42   : > { %1895 = vmatmul.msk.bf16.gmra.mxu0 %vm354_vm0, %v2407_v7  ;;  %v2436_v7 = vld [vmem:[%s2955_s5] sm:$0xff] }
  0x8f   : > { %v420_v14 = vpop.f32.mrf.mxu1  ;;  %v370_v15 = vpop.f32.mrf.mxu0 }
  0x97   : > { %v422_v19 = vpop.f32.mrf.mxu1  ;;  %v372_v20 = vpop.f32.mrf.mxu0 }
  0x98   : > { %v430_v21 = vpack.c.bf16 %v422_v19, %v420_v14  ;;  %v380_v31 = vpack.c.bf16 %v372_v20, %v370_v15 }
  0x9a   : > { %1862 = vmatmul.msk.bf16.vlgmr.msra.gmra.mxu2 %vm465_vm1, %v430_v21 }
  0x9b   : > { %1005 = vmatpush.bf16.msra.mxu2 %v2443_v54  ;;  %v2446_v54 = vld [vmem:[%s2955_s5 + $0x50] sm:$0xff] }
  0x9f   : > { %v425_v24 = vpop.f32.mrf.mxu1  ;;  %v375_v25 = vpop.f32.mrf.mxu0  ;;  %1006 = vmatpush.bf16.msra.mxu2 %v2442_v56  ;;  %v2445_v56 = vld [vmem:[%s2955_s5 + $0x48] sm:$0xff] }
  0xa3   : > { %1007 = vmatpush.bf16.msra.mxu2 %v2441_v57  ;;  %v2444_v57 = vld [vmem:[%s2955_s5 + $0x40] sm:$0xff] }
  0xa7   : > { %v427_v27 = vpop.f32.mrf.mxu1  ;;  %v377_v28 = vpop.f32.mrf.mxu0  ;;  %1008 = vmatpush.bf16.msra.mxu2 %v2440_v59  ;;  %v2431_v59 = vld [vmem:[%s2955_s5 + $0xe8] sm:$0xff] }
  0xa8   : > { %v431_v29 = vpack.c.bf16 %v427_v27, %v425_v24  ;;  %v381_v36 = vpack.c.bf16 %v377_v28, %v375_v25 }
  0xaa   : > { %1863 = vmatmul.msk.bf16.vlgmr.msra.gmra.mxu3 %vm465_vm1, %v431_v29  ;;  %1934 = vmatmul.msk.bf16.vlgmr.msrb.gmra.mxu2 %vm354_vm0, %v2412_v26 }
  0xab   : > { %729 = vmatpush.bf16.msra.mxu3 %v2417_v39  ;;  %1009 = vmatpush.bf16.msra.mxu2 %v2439_v61 }
  0xaf   : > { %v570_v30 = vpop.f32.mrf.mxu0  ;;  %730 = vmatpush.bf16.msra.mxu3 %v2416_v40  ;;  %1010 = vmatpush.bf16.msra.mxu2 %v2438_v2 }
  0xb3   : > { %731 = vmatpush.bf16.msra.mxu3 %v2415_v41  ;;  %1011 = vmatpush.bf16.msra.mxu2 %v2437_v3  ;;  %v2425_v41 = vld [vmem:[%s2955_s5 + $0xb8] sm:$0xff]  ;;  %v2430_v3 = vld [vmem:[%s2955_s5 + $0xe0] sm:$0xff] }
  0xb7   : > { %v572_v33 = vpop.f32.mrf.mxu0  ;;  %732 = vmatpush.bf16.msra.mxu3 %v2414_v42  ;;  %1012 = vmatpush.bf16.msra.mxu2 %v2436_v7  ;;  %v2424_v42 = vld [vmem:[%s2955_s5 + $0xb0] sm:$0xff] }
  0xb8   : > { %v580_v34 = vpack.c.bf16 %v572_v33, %v570_v30  ;;  %v2428_v7 = vld [vmem:[%s2955_s5 + $0xd0] sm:$0xff] }
  0xba   : > { %1880 = vmatmul.msk.bf16.vlgmr.msrb.gmra.mxu3 %vm465_vm1, %v380_v31  ;;  %1935 = vmatmul.msk.bf16.gmra.mxu2 %vm354_vm0, %v2413_v32 }
  0xbb   : > { %1920 = vmatmul.msk.bf16.vlgmr.msrb.gmra.mxu1 %vm465_vm1, %v580_v34 }
  0xbf   : > { %v575_v35 = vpop.f32.mrf.mxu0 }
  0xc7   : > { %v577_v37 = vpop.f32.mrf.mxu0 }
  0xc8   : > { %v581_v38 = vpack.c.bf16 %v577_v37, %v575_v35 }
  0xca   : > { %1881 = vmatmul.msk.bf16.gmra.mxu3 %vm465_vm1, %v381_v36 }
  0xcb   : > { %1921 = vmatmul.msk.bf16.gmra.mxu1 %vm465_vm1, %v581_v38 }
  0xdb   : > { %2012 = vmatmul.msk.bf16.vlgmr.msra.gmra.mxu1 %vm828_vm2, %v2689_v1 }
  0xeb   : > { %2013 = vmatmul.msk.bf16.gmra.mxu1 %vm828_vm2, %v2711_v16 }
 0x11d   : > { %v481_v43 = vpop.f32.mrf.mxu2 }
 0x125   : > { %v483_v44 = vpop.f32.mrf.mxu2 }
 0x12d   : > { %v674_v45 = vpop.f32.mrf.mxu2  ;;  %v486_v51 = vpop.f32.mrf.mxu3 }
 0x135   : > { %v676_v46 = vpop.f32.mrf.mxu2  ;;  %v488_v52 = vpop.f32.mrf.mxu3 }
 0x136   : > { %v684_v47 = vpack.c.bf16 %v676_v46, %v674_v45  ;;  %v2421_v45 = vld [vmem:[%s2955_s5 + $0x98] sm:$0xff]  ;;  %v2420_v46 = vld [vmem:[%s2955_s5 + $0x90] sm:$0xff] }
 0x138   : > { %1960 = vmatmul.msk.bf16.vlgmr.msra.gmra.mxu3 %vm465_vm1, %v684_v47  ;;  %v630_v63 = vpop.f32.mrf.mxu1  ;;  %v2451_v47 = vld [vmem:[%s2955_s5 + $0x78] sm:$0xff] }
 0x139   : > { %1024 = vmatpush.bf16.msrb.mxu3 %v2451_v47 }
 0x13d   : > { %v679_v48 = vpop.f32.mrf.mxu2  ;;  %v530_v53 = vpop.f32.mrf.mxu3 }
 0x13e   : > { %v531_v4 = vadd.f32 %v530_v53, %v481_v43  ;;  %v2423_v43 = vld [vmem:[%s2955_s5 + $0xa8] sm:$0xff]  ;;  %v2447_v53 = vld [vmem:[%s2955_s5 + $0x58] sm:$0xff] }
 0x140   : > { %v640_v8 = vadd.f32 %v630_v63, %v531_v4  ;;  %v632_v9 = vpop.f32.mrf.mxu1  ;;  %v2429_v4 = vld [vmem:[%s2955_s5 + $0xd8] sm:$0xff] }
 0x145   : > { %v681_v49 = vpop.f32.mrf.mxu2  ;;  %v532_v55 = vpop.f32.mrf.mxu3 }
 0x146   : > { %v685_v50 = vpack.c.bf16 %v681_v49, %v679_v48  ;;  %v533_v10 = vadd.f32 %v532_v55, %v483_v44  ;;  %v2422_v44 = vld [vmem:[%s2955_s5 + $0xa0] sm:$0xff]  ;;  %v2419_v48 = vld [vmem:[%s2955_s5 + $0x88] sm:$0xff]  ;;  %v2450_v49 = vld [vmem:[%s2955_s5 + $0x70] sm:$0xff] }
 0x147   : > { %1025 = vmatpush.bf16.msrb.mxu3 %v2450_v49  ;;  %v2433_v55 = vld [vmem:[%s2955_s5 + $0xf8] sm:$0xff] }
 0x148   : > { %1961 = vmatmul.msk.bf16.gmra.mxu3 %vm465_vm1, %v685_v50  ;;  %v641_v13 = vadd.f32 %v632_v9, %v533_v10  ;;  %v635_v18 = vpop.f32.mrf.mxu1  ;;  %v2418_v50 = vld [vmem:[%s2955_s5 + $0x80] sm:$0xff]  ;;  %1158 = vmatpush.bf16.msrb.mxu1 %v2433_v55  ;;  %v2427_v9 = vld [vmem:[%s2955_s5 + $0xc8] sm:$0xff] }
 0x149   : > { %v2426_v10 = vld [vmem:[%s2955_s5 + $0xc0] sm:$0xff] }
 0x14d   : > { %v535_v58 = vpop.f32.mrf.mxu3 }
 0x14e   : > { %v536_v21 = vadd.f32 %v535_v58, %v486_v51  ;;  %v2449_v51 = vld [vmem:[%s2955_s5 + $0x68] sm:$0xff]  ;;  %v2432_v58 = vld [vmem:[%s2955_s5 + $0xf0] sm:$0xff] }
 0x14f   : > { %1026 = vmatpush.bf16.msrb.mxu3 %v2449_v51  ;;  %1159 = vmatpush.bf16.msrb.mxu1 %v2432_v58  ;;  %v2477_v58 = vld [vmem:[%s2956_s6 + $0x78] sm:$0xff] }
 0x150   : > { %v642_v26 = vadd.f32 %v635_v18, %v536_v21  ;;  %v637_v30 = vpop.f32.mrf.mxu1  ;;  %v2468_v21 = vld [vmem:[%s2955_s5 + $0x170] sm:$0xff] }
 0x153   : > { %1160 = vmatpush.bf16.msrb.mxu1 %v2431_v59  ;;  %v2476_v59 = vld [vmem:[%s2956_s6 + $0x70] sm:$0xff] }
 0x155   : > { %v537_v0 = vpop.f32.mrf.mxu3 }
 0x156   : > { %v538_v28 = vadd.f32 %v537_v0, %v488_v52  ;;  %v2448_v52 = vld [vmem:[%s2955_s5 + $0x60] sm:$0xff] }
 0x157   : > { %1027 = vmatpush.bf16.msrb.mxu3 %v2448_v52  ;;  %1161 = vmatpush.bf16.msrb.mxu1 %v2430_v3  ;;  %v2474_v3 = vld [vmem:[%s2956_s6 + $0x60] sm:$0xff] }
 0x158   : > { %v643_v31 = vadd.f32 %v637_v30, %v538_v28  ;;  %v863_v61 = vpop.f32.mrf.mxu1  ;;  %v2460_v28 = vld [vmem:[%s2955_s5 + $0x130] sm:$0xff] }
 0x15b   : > { %1028 = vmatpush.bf16.msrb.mxu3 %v2447_v53  ;;  %1162 = vmatpush.bf16.msrb.mxu1 %v2429_v4  ;;  %v2473_v4 = vld [vmem:[%s2956_s6 + $0x58] sm:$0xff] }
 0x15f   : > { %1029 = vmatpush.bf16.msrb.mxu3 %v2446_v54  ;;  %1163 = vmatpush.bf16.msrb.mxu1 %v2428_v7  ;;  %v2472_v7 = vld [vmem:[%s2956_s6 + $0x50] sm:$0xff] }
 0x160   : > { %v865_v63 = vpop.f32.mrf.mxu1 }
 0x161   : > { %v874_v0 = vpack.c.bf16 %v865_v63, %v863_v61  ;;  %v2475_v61 = vld [vmem:[%s2956_s6 + $0x68] sm:$0xff] }
 0x163   : > { %1030 = vmatpush.bf16.msrb.mxu3 %v2445_v56  ;;  %1164 = vmatpush.bf16.msrb.mxu1 %v2427_v9  ;;  %v2471_v9 = vld [vmem:[%s2956_s6 + $0x48] sm:$0xff] }
 0x167   : > { %1031 = vmatpush.bf16.msrb.mxu3 %v2444_v57  ;;  %1165 = vmatpush.bf16.msrb.mxu1 %v2426_v10 }
 0x168   : > { %v868_v2 = vpop.f32.mrf.mxu1 }
 0x16a   : > { %1032 = vmatmul.bf16.vlgmr.msrb.gmra.mxu3 %v874_v0  ;;  %1166 = vmatmul.bf16.vlgmr.msrb.gmra.mxu1 %v2683_v62 }
 0x16b   : > { %1223 = vmatpush.bf16.msra.mxu3 %v2677_v60 }
 0x16f   : > { %1224 = vmatpush.bf16.msra.mxu3 %v2683_v62 }
 0x17a   : > { %1171 = vmatmul.bf16.gmra.mxu1 %v2677_v60  ;;  %v2469_v60 = vld [vmem:[%s2955_s5 + $0x178] sm:$0xff] }
 0x17b   : > { %1388 = vmatpush.bf16.msra.mxu1 %v2469_v60 }
 0x17f   : > { %1389 = vmatpush.bf16.msra.mxu1 %v2468_v21 }
 0x1bb   : > { %v734_v6 = vpop.f32.mrf.mxu3 }
 0x1bc   : > { %v744_v11 = vadd.f32 %v734_v6, %v640_v8  ;;  %v870_v6 = vpop.f32.mrf.mxu1 }
 0x1bd   : > { %v876_v8 = vpack.c.bf16 %v870_v6, %v868_v2 }
 0x1be   : > { %v749_v14 = vadd.f32 %v748_v12, %v744_v11  ;;  %v2797_v11 = vld [vmem:[%s2954_s4 + $0x10] sm:$0xff] }
 0x1bf   : > { %1037 = vmatmul.bf16.gmra.mxu3 %v876_v8 }
 0x1c0   : > { %v753_v19 = vpack.c.bf16 %v749_v14, %v749_v14 }
 0x1c2   : > { %v761_v23 = vunpack.c.l.b16 %v753_v19 }
 0x1c3   : > { %v736_v15 = vpop.f32.mrf.mxu3 }
 0x1c4   : > { %v745_v17 = vadd.f32 %v736_v15, %v641_v13  ;;  %v2805_v15 = vld [vmem:[%s2954_s4 + $0x18] sm:$0xff] }
 0x1c6   : > { %v750_v20 = vadd.f32 %v748_v12, %v745_v17 }
 0x1c8   : > { %v754_v22 = vpack.c.bf16 %v750_v20, %v750_v20 }
 0x1ca   : > { %v762_v24 = vunpack.c.l.b16 %v754_v22 }
 0x1cb   : > { %v739_v25 = vpop.f32.mrf.mxu3 }
 0x1cc   : > { %v765_v27 = vpack.c.b16 %v762_v24, %v761_v23  ;;  %v746_v29 = vadd.f32 %v739_v25, %v642_v26  ;;  %v2467_v23 = vld [vmem:[%s2955_s5 + $0x168] sm:$0xff]  ;;  %v2466_v24 = vld [vmem:[%s2955_s5 + $0x160] sm:$0xff]  ;;  %v2461_v26 = vld [vmem:[%s2955_s5 + $0x138] sm:$0xff] }
 0x1cd   : > { %1390 = vmatpush.bf16.msra.mxu1 %v2467_v23  ;;  %v1411_v23 = vperm.slane %v2702_v5, 1 }
 0x1ce   : > { %v751_v32 = vadd.f32 %v748_v12, %v746_v29  ;;  %v2464_v29 = vld [vmem:[%s2955_s5 + $0x150] sm:$0xff] }
 0x1cf   : > { %2156 = vmatmul.msk.bf16.vlgmr.msra.gmra.mxu3 %vm828_vm2, %v2797_v11 }
 0x1d0   : > { %v755_v35 = vpack.c.bf16 %v751_v32, %v751_v32  ;;  %v2463_v32 = vld [vmem:[%s2955_s5 + $0x148] sm:$0xff] }
 0x1d1   : > { %1391 = vmatpush.bf16.msra.mxu1 %v2466_v24 }
 0x1d2   : > { %v763_v38 = vunpack.c.l.b16 %v755_v35 }
 0x1d3   : > { %v741_v33 = vpop.f32.mrf.mxu3 }
 0x1d4   : > { %v747_v34 = vadd.f32 %v741_v33, %v643_v31  ;;  %v2459_v31 = vld [vmem:[%s2955_s5 + $0x128] sm:$0xff]  ;;  %v2458_v33 = vld [vmem:[%s2955_s5 + $0x120] sm:$0xff] }
 0x1d6   : > { %v752_v36 = vadd.f32 %v748_v12, %v747_v34  ;;  %v2462_v34 = vld [vmem:[%s2955_s5 + $0x140] sm:$0xff] }
 0x1d8   : > { %v756_v37 = vpack.c.bf16 %v752_v36, %v752_v36 }
 0x1da   : > { %v764_v39 = vunpack.c.l.b16 %v756_v37  ;;  %v2457_v37 = vld [vmem:[%s2955_s5 + $0x118] sm:$0xff] }
 0x1dc   : > { %v766_v40 = vpack.c.b16 %v764_v39, %v763_v38  ;;  %v2456_v38 = vld [vmem:[%s2955_s5 + $0x110] sm:$0xff] }
 0x1de   : > { %841 = vmatpush.bf16.msra.mxu0 %v766_v40  ;;  %1204 = vmatpush.bf16.msrb.mxu2 %v766_v40 }
 0x1df   : > { %2157 = vmatmul.msk.bf16.gmra.mxu3 %vm828_vm2, %v2805_v15 }
 0x1e2   : > { %842 = vmatpush.bf16.msra.mxu0 %v765_v27  ;;  %1205 = vmatpush.bf16.msrb.mxu2 %v765_v27 }
 0x1e5   : > { %2010 = vmatmul.msk.bf16.vlgmr.msra.gmra.mxu0 %vm828_vm2, %v2689_v1 }
 0x1e6   : > { %1139 = vmatpush.bf16.msrb.mxu0 %v2425_v41  ;;  %v2455_v41 = vld [vmem:[%s2955_s5 + $0x108] sm:$0xff] }
 0x1e7   : > { %v1167_v63 = vpop.f32.mrf.mxu1 }
 0x1ea   : > { %1140 = vmatpush.bf16.msrb.mxu0 %v2424_v42 }
 0x1ed   : > { %v1033_v19 = vpop.f32.mrf.mxu3 }
 0x1ee   : > { %1141 = vmatpush.bf16.msrb.mxu0 %v2423_v43  ;;  %v2454_v43 = vld [vmem:[%s2955_s5 + $0x100] sm:$0xff] }
 0x1ef   : > { %v1169_v2 = vpop.f32.mrf.mxu1 }
 0x1f2   : > { %1142 = vmatpush.bf16.msrb.mxu0 %v2422_v44 }
 0x1f5   : > { %2011 = vmatmul.msk.bf16.gmra.mxu0 %vm828_vm2, %v2711_v16  ;;  %v1035_v20 = vpop.f32.mrf.mxu3 }
 0x1f6   : > { %1143 = vmatpush.bf16.msrb.mxu0 %v2421_v45 }
 0x1f7   : > { %v1172_v8 = vpop.f32.mrf.mxu1 }
 0x1fa   : > { %1144 = vmatpush.bf16.msrb.mxu0 %v2420_v46 }
 0x1fe   : > { %1145 = vmatpush.bf16.msrb.mxu0 %v2419_v48 }
 0x202   : > { %1146 = vmatpush.bf16.msrb.mxu0 %v2418_v50 }
 0x205   : > { %1147 = vmatmul.bf16.vlgmr.msrb.gmra.mxu0 %v765_v27  ;;  %v2465_v27 = vld [vmem:[%s2955_s5 + $0x158] sm:$0xff] }
 0x206   : > { %1369 = vmatpush.bf16.msra.mxu0 %v2461_v26  ;;  %1392 = vmatpush.bf16.msra.mxu1 %v2465_v27 }
 0x20a   : > { %1370 = vmatpush.bf16.msra.mxu0 %v2460_v28  ;;  %1393 = vmatpush.bf16.msra.mxu1 %v2464_v29 }
 0x20e   : > { %1371 = vmatpush.bf16.msra.mxu0 %v2459_v31  ;;  %1394 = vmatpush.bf16.msra.mxu1 %v2463_v32 }
 0x212   : > { %1372 = vmatpush.bf16.msra.mxu0 %v2458_v33  ;;  %1395 = vmatpush.bf16.msra.mxu1 %v2462_v34 }
 0x215   : > { %1152 = vmatmul.bf16.gmra.mxu0 %v766_v40 }
 0x216   : > { %1373 = vmatpush.bf16.msra.mxu0 %v2457_v37 }
 0x21a   : > { %1374 = vmatpush.bf16.msra.mxu0 %v2456_v38 }
 0x21e   : > { %1375 = vmatpush.bf16.msra.mxu0 %v2455_v41 }
 0x222   : > { %1376 = vmatpush.bf16.msra.mxu0 %v2454_v43 }
 0x226   : > { %1591 = vmatpush.bf16.msrb.mxu0 %v2477_v58  ;;  %v2480_v58 = vld [vmem:[%s2956_s6 + $0x10] sm:$0xff] }
 0x22a   : > { %1592 = vmatpush.bf16.msrb.mxu0 %v2476_v59  ;;  %v2479_v59 = vld [vmem:[%s2956_s6 + $0x8] sm:$0xff] }
 0x22e   : > { %1593 = vmatpush.bf16.msrb.mxu0 %v2475_v61  ;;  %v2486_v61 = vld [vmem:[%s2956_s6 + $0x80] sm:$0xff] }
 0x232   : > { %1594 = vmatpush.bf16.msrb.mxu0 %v2474_v3 }
 0x236   : > { %1595 = vmatpush.bf16.msrb.mxu0 %v2473_v4 }
 0x23a   : > { %1596 = vmatpush.bf16.msrb.mxu0 %v2472_v7 }
 0x23e   : > { %1597 = vmatpush.bf16.msrb.mxu0 %v2471_v9 }
 0x242   : > { %v1038_v22 = vpop.f32.mrf.mxu3 }
 0x24a   : > { %v1040_v25 = vpop.f32.mrf.mxu3 }
 0x252   : > { %v1226_v30 = vpop.f32.mrf.mxu3 }
 0x25a   : > { %v1228_v35 = vpop.f32.mrf.mxu3 }
 0x25b   : > { %v1237_v36 = vpack.c.bf16 %v1228_v35, %v1226_v30 }
 0x25d   : > { %1396 = vmatmul.bf16.vlgmr.msra.gmra.mxu1 %v1237_v36 }
 0x262   : > { %v844_v12 = vpop.f32.mrf.mxu0  ;;  %v1231_v40 = vpop.f32.mrf.mxu3 }
 0x26a   : > { %v846_v13 = vpop.f32.mrf.mxu0  ;;  %v1233_v45 = vpop.f32.mrf.mxu3 }
 0x26b   : > { %v873_v14 = vpack.c.bf16 %v846_v13, %v844_v12  ;;  %v1239_v47 = vpack.c.bf16 %v1233_v45, %v1231_v40  ;;  %v2470_v12 = vld [vmem:[%s2956_s6 + $0x40] sm:$0xff]  ;;  %v1174_v13 = vpop.f32.mrf.mxu1 }
 0x26c   : > { %1598 = vmatpush.bf16.msrb.mxu0 %v2470_v12 }
 0x26d   : > { %1013 = vmatmul.bf16.vlgmr.msra.gmra.mxu2 %v873_v14  ;;  %1401 = vmatmul.bf16.gmra.mxu1 %v1239_v47 }
 0x272   : > { %v849_v62 = vpop.f32.mrf.mxu0 }
 0x27a   : > { %v851_v17 = vpop.f32.mrf.mxu0 }
 0x27b   : > { %v875_v18 = vpack.c.bf16 %v851_v17, %v849_v62 }
 0x27d   : > { %1018 = vmatmul.bf16.gmra.mxu2 %v875_v18 }
 0x282   : > { %v1148_v0 = vpop.f32.mrf.mxu0 }
 0x28a   : > { %v1150_v6 = vpop.f32.mrf.mxu0 }
 0x28d   : > { %2154 = vmatmul.msk.bf16.vlgmr.msrb.gmra.mxu2 %vm828_vm2, %v2797_v11 }
 0x292   : > { %v1153_v10 = vpop.f32.mrf.mxu0 }
 0x29a   : > { %v1155_v14 = vpop.f32.mrf.mxu0 }
 0x29d   : > { %2155 = vmatmul.msk.bf16.gmra.mxu2 %vm828_vm2, %v2805_v15 }
 0x2da   : > { %v1397_v62 = vpop.f32.mrf.mxu1 }
 0x2f0   : > { %v1014_v39 = vpop.f32.mrf.mxu2 }
 0x2f1   : > { %v1034_v42 = vadd.f32 %v1033_v19, %v1014_v39  ;;  %v1399_v19 = vpop.f32.mrf.mxu1 }
 0x2f3   : > { %v1149_v18 = vadd.f32 %v1148_v0, %v1034_v42 }
 0x2f8   : > { %v1016_v44 = vpop.f32.mrf.mxu2 }
 0x2f9   : > { %v1036_v46 = vadd.f32 %v1035_v20, %v1016_v44  ;;  %v1168_v20 = vadd.f32 %v1167_v63, %v1149_v18  ;;  %v1402_v30 = vpop.f32.mrf.mxu1  ;;  %v2478_v63 = vld [vmem:[%s2956_s6] sm:$0xff] }
 0x2fb   : > { %v1151_v21 = vadd.f32 %v1150_v6, %v1036_v46 }
 0x300   : > { %v1019_v48 = vpop.f32.mrf.mxu2 }
 0x301   : > { %v1039_v49 = vadd.f32 %v1038_v22, %v1019_v48  ;;  %v1404_v40 = vpop.f32.mrf.mxu1 }
 0x303   : > { %v1154_v34 = vadd.f32 %v1153_v10, %v1039_v49  ;;  %v2493_v49 = vld [vmem:[%s2956_s6 + $0xb8] sm:$0xff] }
 0x305   : > { %v1173_v37 = vadd.f32 %v1172_v8, %v1154_v34 }
 0x308   : > { %v1021_v50 = vpop.f32.mrf.mxu2 }
 0x309   : > { %v1041_v51 = vadd.f32 %v1040_v25, %v1021_v50  ;;  %v1170_v25 = vadd.f32 %v1169_v2, %v1151_v21 }
 0x30b   : > { %v1156_v38 = vadd.f32 %v1155_v14, %v1041_v51  ;;  %v2492_v51 = vld [vmem:[%s2956_s6 + $0xb0] sm:$0xff] }
 0x30d   : > { %v1175_v42 = vadd.f32 %v1174_v13, %v1156_v38 }
 0x310   : > { %v1207_v52 = vpop.f32.mrf.mxu2 }
 0x318   : > { %v1209_v53 = vpop.f32.mrf.mxu2 }
 0x319   : > { %v1236_v54 = vpack.c.bf16 %v1209_v53, %v1207_v52  ;;  %v2483_v52 = vld [vmem:[%s2956_s6 + $0x28] sm:$0xff]  ;;  %v2482_v53 = vld [vmem:[%s2956_s6 + $0x20] sm:$0xff] }
 0x31b   : > { %1377 = vmatmul.bf16.vlgmr.msra.gmra.mxu0 %v1236_v54  ;;  %v2489_v54 = vld [vmem:[%s2956_s6 + $0x98] sm:$0xff] }
 0x320   : > { %v1212_v55 = vpop.f32.mrf.mxu2 }
 0x328   : > { %v1214_v56 = vpop.f32.mrf.mxu2 }
 0x329   : > { %v1238_v57 = vpack.c.bf16 %v1214_v56, %v1212_v55  ;;  %v2488_v55 = vld [vmem:[%s2956_s6 + $0x90] sm:$0xff]  ;;  %v2481_v56 = vld [vmem:[%s2956_s6 + $0x18] sm:$0xff] }
 0x32b   : > { %1382 = vmatmul.bf16.gmra.mxu0 %v1238_v57  ;;  %v2487_v57 = vld [vmem:[%s2956_s6 + $0x88] sm:$0xff] }
 0x398   : > { %v1378_v17 = vpop.f32.mrf.mxu0 }
 0x399   : > { %v1398_v60 = vadd.f32 %v1397_v62, %v1378_v17 }
 0x39b   : > { %v1407_v22 = vadd.f32 %v1398_v60, %v1168_v20 }
 0x39d   : > { %v1412_v27 = vadd.f32 %v1411_v23, %v1407_v22 }
 0x39f   : > { %v1416_v31 = vmax.f32 %v1412_v27, 0.0 }
 0x3a0   : > { %v1380_v24 = vpop.f32.mrf.mxu0 }
 0x3a1   : > { %v1400_v26 = vadd.f32 %v1399_v19, %v1380_v24  ;;  %v1719_v19 = vperm.slane %v2702_v5, 2 }
 0x3a3   : > { %v1408_v28 = vadd.f32 %v1400_v26, %v1170_v25 }
 0x3a5   : > { %v1413_v29 = vadd.f32 %v1411_v23, %v1408_v28 }
 0x3a7   : > { %v1417_v32 = vmax.f32 %v1413_v29, 0.0 }
 0x3a8   : > { %v1383_v33 = vpop.f32.mrf.mxu0 }
 0x3a9   : > { %v1420_v35 = vpack.c.bf16 %v1417_v32, %v1416_v31  ;;  %v1403_v36 = vadd.f32 %v1402_v30, %v1383_v33 }
 0x3ab   : > { %1599 = vmatmul.bf16.vlgmr.msrb.gmra.mxu0 %v1420_v35  ;;  %v1409_v39 = vadd.f32 %v1403_v36, %v1173_v37 }
 0x3ad   : > { %v1414_v44 = vadd.f32 %v1411_v23, %v1409_v39 }
 0x3af   : > { %v1418_v47 = vmax.f32 %v1414_v44, 0.0 }
 0x3b0   : > { %v1385_v41 = vpop.f32.mrf.mxu0 }
 0x3b1   : > { %v1405_v43 = vadd.f32 %v1404_v40, %v1385_v41 }
 0x3b3   : > { %v1410_v45 = vadd.f32 %v1405_v43, %v1175_v42 }
 0x3b5   : > { %v1415_v46 = vadd.f32 %v1411_v23, %v1410_v45 }
 0x3b7   : > { %v1419_v48 = vmax.f32 %v1415_v46, 0.0 }
 0x3b9   : > { %v1421_v50 = vpack.c.bf16 %v1419_v48, %v1418_v47 }
 0x3bb   : > { %1445 = vmatpush.bf16.msra.mxu2 %v1421_v50  ;;  %1604 = vmatmul.bf16.gmra.mxu0 %v1421_v50 }
 0x3bc   : > { %1616 = vmatpush.bf16.msrb.mxu1 %v1421_v50 }
 0x3bf   : > { %1446 = vmatpush.bf16.msra.mxu2 %v1420_v35 }
 0x3c0   : > { %1617 = vmatpush.bf16.msrb.mxu1 %v1420_v35 }
 0x3c2   : > { %2270 = vmatmul.msk.bf16.vlgmr.msra.gmra.mxu2 %vm828_vm2, %v2689_v1  ;;  %v2485_v1 = vld [vmem:[%s2956_s6 + $0x38] sm:$0xff] }
 0x3c3   : > { %2336 = vmatmul.msk.bf16.vlgmr.msrb.gmra.mxu1 %vm828_vm2, %v2797_v11  ;;  %1696 = vmatpush.bf16.msrb.mxu2 %v2493_v49  ;;  %v2491_v11 = vld [vmem:[%s2956_s6 + $0xa8] sm:$0xff] }
 0x3c4   : > { %1524 = vmatpush.bf16.msrb.mxu3 %v2485_v1 }
 0x3c7   : > { %1697 = vmatpush.bf16.msrb.mxu2 %v2492_v51 }
 0x3cb   : > { %1698 = vmatpush.bf16.msrb.mxu2 %v2491_v11 }
 0x3d2   : > { %2271 = vmatmul.msk.bf16.gmra.mxu2 %vm828_vm2, %v2711_v16  ;;  %v2484_v16 = vld [vmem:[%s2956_s6 + $0x30] sm:$0xff] }
 0x3d3   : > { %2337 = vmatmul.msk.bf16.gmra.mxu1 %vm828_vm2, %v2805_v15  ;;  %1525 = vmatpush.bf16.msrb.mxu3 %v2484_v16  ;;  %v2490_v15 = vld [vmem:[%s2956_s6 + $0xa0] sm:$0xff] }
 0x3d4   : > { %1699 = vmatpush.bf16.msrb.mxu2 %v2490_v15 }
 0x3d7   : > { %1526 = vmatpush.bf16.msrb.mxu3 %v2483_v52 }
 0x3d8   : > { %1700 = vmatpush.bf16.msrb.mxu2 %v2489_v54 }
 0x3db   : > { %1527 = vmatpush.bf16.msrb.mxu3 %v2482_v53 }
 0x3dc   : > { %1701 = vmatpush.bf16.msrb.mxu2 %v2488_v55 }
 0x3df   : > { %1528 = vmatpush.bf16.msrb.mxu3 %v2481_v56 }
 0x3e0   : > { %1702 = vmatpush.bf16.msrb.mxu2 %v2487_v57 }
 0x3e3   : > { %1529 = vmatpush.bf16.msrb.mxu3 %v2480_v58 }
 0x3e4   : > { %1703 = vmatpush.bf16.msrb.mxu2 %v2486_v61 }
 0x3e7   : > { %1530 = vmatpush.bf16.msrb.mxu3 %v2479_v59 }
 0x3eb   : > { %1531 = vmatpush.bf16.msrb.mxu3 %v2478_v63 }
 0x428   : > { %v1600_v62 = vpop.f32.mrf.mxu0 }
 0x430   : > { %v1602_v21 = vpop.f32.mrf.mxu0 }
 0x438   : > { %v1605_v29 = vpop.f32.mrf.mxu0 }
 0x440   : > { %v1619_v0 = vpop.f32.mrf.mxu1  ;;  %v1607_v36 = vpop.f32.mrf.mxu0 }
 0x445   : > { %v1448_v2 = vpop.f32.mrf.mxu2 }
 0x448   : > { %v1621_v3 = vpop.f32.mrf.mxu1 }
 0x449   : > { %v1629_v4 = vpack.c.bf16 %v1621_v3, %v1619_v0 }
 0x44b   : > { %1704 = vmatmul.bf16.vlgmr.msrb.gmra.mxu2 %v1629_v4 }
 0x44d   : > { %v1450_v6 = vpop.f32.mrf.mxu2 }
 0x44e   : > { %v1458_v7 = vpack.c.bf16 %v1450_v6, %v1448_v2 }
 0x450   : > { %1532 = vmatmul.bf16.vlgmr.msrb.gmra.mxu3 %v1458_v7  ;;  %v1624_v8 = vpop.f32.mrf.mxu1 }
 0x455   : > { %v1453_v9 = vpop.f32.mrf.mxu2 }
 0x458   : > { %v1626_v10 = vpop.f32.mrf.mxu1 }
 0x459   : > { %v1630_v12 = vpack.c.bf16 %v1626_v10, %v1624_v8 }
 0x45b   : > { %1709 = vmatmul.bf16.gmra.mxu2 %v1630_v12 }
 0x45d   : > { %v1455_v13 = vpop.f32.mrf.mxu2 }
 0x45e   : > { %v1459_v14 = vpack.c.bf16 %v1455_v13, %v1453_v9 }
 0x460   : > { %1537 = vmatmul.bf16.gmra.mxu3 %v1459_v14 }
 0x4ce   : > { %v1705_v17 = vpop.f32.mrf.mxu2 }
 0x4d3   : > { %v1533_v18 = vpop.f32.mrf.mxu3 }
 0x4d4   : > { %v1601_v60 = vadd.f32 %v1600_v62, %v1533_v18 }
 0x4d6   : > { %v1715_v20 = vadd.f32 %v1705_v17, %v1601_v60  ;;  %v1707_v23 = vpop.f32.mrf.mxu2 }
 0x4d8   : > { %v1720_v22 = vadd.f32 %v1719_v19, %v1715_v20 }
 0x4da   : > { %v1724_v24 = vmax.f32 %v1720_v22, 0.0 }
 0x4db   : > { %v1535_v25 = vpop.f32.mrf.mxu3 }
 0x4dc   : > { %1728 = vst [vmem:[%s325_s20] sm:$0xff] %v1724_v24  ;;  %v1603_v26 = vadd.f32 %v1602_v21, %v1535_v25 }
 0x4de   : > { %v1716_v27 = vadd.f32 %v1707_v23, %v1603_v26  ;;  %v1710_v32 = vpop.f32.mrf.mxu2 }
 0x4e0   : > { %v1721_v28 = vadd.f32 %v1719_v19, %v1716_v27 }
 0x4e2   : > { %v1725_v30 = vmax.f32 %v1721_v28, 0.0 }
 0x4e3   : > { %v1538_v31 = vpop.f32.mrf.mxu3 }
 0x4e4   : > { %1729 = vst [vmem:[%s325_s20 + $0x8] sm:$0xff] %v1725_v30  ;;  %v1606_v5 = vadd.f32 %v1605_v29, %v1538_v31 }
 0x4e6   : > { %v1717_v33 = vadd.f32 %v1710_v32, %v1606_v5  ;;  %v1712_v39 = vpop.f32.mrf.mxu2 }
 0x4e8   : > { %v1722_v34 = vadd.f32 %v1719_v19, %v1717_v33 }
 0x4ea   : > { %v1726_v35 = vmax.f32 %v1722_v34, 0.0 }
 0x4eb   : > { %v1540_v37 = vpop.f32.mrf.mxu3 }
 0x4ec   : > { %1730 = vst [vmem:[%s325_s20 + $0x10] sm:$0xff] %v1726_v35  ;;  %v1608_v38 = vadd.f32 %v1607_v36, %v1540_v37 }
 0x4ee   : > { %v1718_v40 = vadd.f32 %v1712_v39, %v1608_v38 }
 0x4f0   : > { %v1723_v41 = vadd.f32 %v1719_v19, %v1718_v40 }
 0x4f2   : > { %v1727_v42 = vmax.f32 %v1723_v41, 0.0 }
 0x4f4   : > { %1731 = vst [vmem:[%s325_s20 + $0x18] sm:$0xff] %v1727_v42 }
 0x4f5 PF: > { %s18_s27 = sadd.s32 1, %s2512_s27  }
 0x4f6   : > { %p15_p4 = scmp.ge.s32.totalorder %s18_s27, 4  }
 0x4f8   :  { %17 = sbr.rel (!%p15_p4) target bundleno = 1 (0x1), region = 96 }

</bundles_post_ra>
